<compile_context>
chip_gen: v5e
topology: v5e:2x2
jax: 0.10.0
libtpu: 0.0.40
codegen_flags: <defaults>
</compile_context>

<pallas_src>
import jax
import jax.numpy as jnp
from jax.experimental import pallas as pl
from jax.experimental.pallas import tpu as pltpu

LANES = 128
SUBLANES = 8


def _round_up(x, m):
    return ((x + m - 1) // m) * m


def _device_kind():
    try:
        return jax.devices()[0].device_kind.lower()
    except Exception:
        return ""


def _elementwise_sums(t, p, om, dm, ow):
    """Plain-JAX x-sigmoid partial sums (used only for tiny tails / tiny inputs)."""
    e = t.astype(jnp.float32) - p.astype(jnp.float32)
    err = e * jnp.tanh(0.5 * e)          # == 2e/(1+exp(-e)) - e
    if om is not None:
        err = err * (om.astype(jnp.float32) * (ow - 1.0) + 1.0)
    if dm is not None:
        dmf = dm.astype(jnp.float32)
        return jnp.sum(err * dmf), jnp.sum(dmf)
    return jnp.sum(err), None


def _make_kernel(has_obs, has_dm, block_rows, num_blocks, blocks_per_core,
                 last_block_rows, needs_edge_mask):
    """Build a kernel statically specialized on mask presence / edge-mask necessity."""
    groups = block_rows // SUBLANES

    def kernel(*refs):
        it = iter(refs)
        ow_ref = next(it) if has_obs else None      # (1,) f32 SMEM scalar prefetch
        t_ref = next(it)
        p_ref = next(it)
        om_ref = next(it) if has_obs else None
        dm_ref = next(it) if has_dm else None
        err_out = next(it)                          # (1, 8, 128) resident accumulator
        dm_out = next(it) if has_dm else None

        c = pl.program_id(0)        # core slot ("parallel")
        i = pl.program_id(1)        # block within this core's range ("arbitrary")

        @pl.when(i == 0)
        def _():
            err_out[...] = jnp.zeros_like(err_out)
            if has_dm:
                dm_out[...] = jnp.zeros_like(dm_out)

        def accumulate(row_mask):
            e = t_ref[...].astype(jnp.float32) - p_ref[...].astype(jnp.float32)
            err = e * jnp.tanh(0.5 * e)             # == 2e/(1+exp(-e)) - e   (EUP)
            if has_obs:
                om = om_ref[...].astype(jnp.float32)
                # obs_mask*w - (obs_mask - 1) == obs_mask*(w-1) + 1   (single FMA)
                err = err * (om * (ow_ref[0] - 1.0) + 1.0)
            if has_dm:
                dm = dm_ref[...].astype(jnp.float32)
                if row_mask is not None:
                    dm = jnp.where(row_mask, dm, 0.0)
                    err = jnp.where(row_mask, err * dm, 0.0)
                else:
                    err = err * dm
                # Sublane-aligned grouped add: (G,8,128) summed over G -> pure VPU.
                dm_out[0] = dm_out[0] + jnp.sum(
                    dm.reshape(groups, SUBLANES, LANES), axis=0)
            elif row_mask is not None:
                err = jnp.where(row_mask, err, 0.0)
            err_out[0] = err_out[0] + jnp.sum(
                err.reshape(groups, SUBLANES, LANES), axis=0)

        if not needs_edge_mask:
            # All blocks are full and exactly covered: zero masking overhead.
            accumulate(None)
        else:
            gblk = c * blocks_per_core + i
            last = num_blocks - 1

            @pl.when(gblk < last)          # interior full blocks: no mask at all
            def _():
                accumulate(None)

            @pl.when(gblk >= last)         # last (possibly partial) block or duplicate
            def _():
                # Valid rows: last_block_rows for the real last block, 0 for the
                # clamped duplicate blocks read by the spare core slot.
                thresh = jnp.where(gblk == last,
                                   jnp.int32(last_block_rows), jnp.int32(0))
                row = jax.lax.broadcasted_iota(jnp.int32, (block_rows, LANES), 0)
                accumulate(row < thresh)

    return kernel


def xsigmoid_loss(target, pred, obs_mask=None, data_mask=None, obs_weight=1.0):
    """Pallas implementation of XSigmoidLoss.forward. Returns an f32 scalar."""
    has_obs = obs_mask is not None
    has_dm = data_mask is not None

    n = int(target.size)                              # static element count
    ow = jnp.asarray(obs_weight, jnp.float32)         # SMEM scalar (no recompiles)

    inputs = [target, pred]
    if has_obs:
        inputs.append(obs_mask)
    if has_dm:
        inputs.append(data_mask)
    flats = [x.reshape(-1) for x in inputs]           # free bitcast (contiguous)

    om_flat = None
    dm_flat = None
    idx = 2
    if has_obs:
        om_flat = flats[idx]; idx += 1
    if has_dm:
        dm_flat = flats[idx]

    # Lane-aligned prefix goes through the kernel; the <128-element tail is plain JAX.
    n_main = (n // LANES) * LANES
    tail_err = jnp.float32(0.0)
    tail_dm = jnp.float32(0.0)
    if n_main != n:
        te, tdm = _elementwise_sums(
            flats[0][n_main:], flats[1][n_main:],
            om_flat[n_main:] if has_obs else None,
            dm_flat[n_main:] if has_dm else None, ow)
        tail_err = te
        if has_dm:
            tail_dm = tdm
        flats = [f[:n_main] for f in flats]

    if n_main == 0:
        # Tiny input: not worth a kernel launch.
        sum_err = tail_err
        sum_dm = tail_dm if has_dm else jnp.float32(n)
        return (sum_err / sum_dm).astype(jnp.float32)

    rows = n_main // LANES
    arrs = [f.reshape(rows, LANES) for f in flats]    # zero-copy when n % 128 == 0

    kind = _device_kind()
    is_v7 = ("v7" in kind) or ("7x" in kind)
    is_v6 = "v6" in kind
    max_rows = 4096 if (is_v6 or is_v7) else 2048     # v5e scoped-VMEM default is small

    block_rows = min(max_rows, _round_up(rows, SUBLANES))   # always a multiple of 8
    num_blocks = pl.cdiv(rows, block_rows)
    ncores = 2 if (is_v7 and num_blocks >= 2) else 1        # megacore only on v7x
    blocks_per_core = pl.cdiv(num_blocks, ncores)
    last_block_rows = rows - (num_blocks - 1) * block_rows
    needs_edge_mask = (last_block_rows != block_rows) or (
        ncores * blocks_per_core != num_blocks)

    # Clamp the block index so a ragged core split never DMAs out of bounds; the
    # duplicate block's contribution is zeroed by the edge mask.
    def in_idx(c, i, *_):
        return (jnp.minimum(c * blocks_per_core + i, num_blocks - 1), 0)

    in_spec = pl.BlockSpec((block_rows, LANES), in_idx)
    out_spec = pl.BlockSpec((1, SUBLANES, LANES), lambda c, i, *_: (c, 0, 0))

    out_shapes = [jax.ShapeDtypeStruct((ncores, SUBLANES, LANES), jnp.float32)]
    out_specs = [out_spec]
    if has_dm:
        out_shapes.append(jax.ShapeDtypeStruct((ncores, SUBLANES, LANES), jnp.float32))
        out_specs.append(out_spec)

    kernel = _make_kernel(has_obs, has_dm, block_rows, num_blocks,
                          blocks_per_core, last_block_rows, needs_edge_mask)

    # VMEM budget: double-buffered input streams (worst-case 4 bytes/elem) + outputs.
    n_streams = len(arrs)
    needed = n_streams * 2 * block_rows * LANES * 4 + 2 * ncores * SUBLANES * LANES * 4
    vmem_limit = int(min(max(2 * needed, 32 << 20), 56 << 20))

    nsp = 1 if has_obs else 0
    call_args = ([ow.reshape(1)] if has_obs else []) + arrs

    outs = pl.pallas_call(
        kernel,
        out_shape=tuple(out_shapes),
        grid_spec=pltpu.PrefetchScalarGridSpec(
            num_scalar_prefetch=nsp,
            grid=(ncores, blocks_per_core),
            in_specs=[in_spec] * n_streams,
            out_specs=tuple(out_specs)),
        compiler_params=pltpu.CompilerParams(
            dimension_semantics=("parallel", "arbitrary"),
            vmem_limit_bytes=vmem_limit),
    )(*call_args)

    sum_err = jnp.sum(outs[0]) + tail_err
    if has_dm:
        sum_dm = jnp.sum(outs[1]) + tail_dm
    else:
        sum_dm = jnp.float32(n)
    return (sum_err / sum_dm).astype(jnp.float32)


def _reference(target, pred, obs_mask=None, data_mask=None, obs_weight=1.0):
    error = target - pred
    error = 2 * error / (1 + jnp.exp(-error)) - error
    if obs_mask is not None:
        weight = obs_mask * obs_weight - (obs_mask - 1)
        error = error * weight
    if data_mask is None:
        return jnp.mean(error)
    return jnp.sum(error * data_mask) / jnp.sum(data_mask)


if __name__ == "__main__":
    key = jax.random.PRNGKey(0)
    k1, k2, k3, k4 = jax.random.split(key, 4)

    B, C, H, W = 2, 4, 16, 16  # NCHW, matching the PyTorch module's typical inputs
    target = jax.random.normal(k1, (B, C, H, W), dtype=jnp.float32)
    pred = jax.random.normal(k2, (B, C, H, W), dtype=jnp.float32)
    obs_mask = (jax.random.uniform(k3, (B, C, H, W)) > 0.5).astype(jnp.float32)
    data_mask = (jax.random.uniform(k4, (B, C, H, W)) > 0.3).astype(jnp.float32)
    obs_weight = 2.0

    cases = [
        (target, pred, obs_mask, data_mask, obs_weight),   # both masks
        (target, pred, None, None, 1.0),                   # plain mean
        (target, pred, obs_mask, None, obs_weight),        # obs mask only
        (target, pred, None, data_mask, 1.0),              # data mask only
    ]

    # Ragged size (not a multiple of 128) -> plain-JAX tail + partial edge block.
    r1, r2, r3, r4 = jax.random.split(jax.random.PRNGKey(1), 4)
    rshape = (2, 3, 7, 11)
    cases.append((jax.random.normal(r1, rshape, dtype=jnp.float32),
                  jax.random.normal(r2, rshape, dtype=jnp.float32),
                  (jax.random.uniform(r3, rshape) > 0.5).astype(jnp.float32),
                  (jax.random.uniform(r4, rshape) > 0.3).astype(jnp.float32),
                  1.5))

    # Multi-block size with a partial last block (exercises interior unmasked path
    # + last-block row mask on every generation).
    m1, m2, m3, m4 = jax.random.split(jax.random.PRNGKey(2), 4)
    mshape = (8, 4, 128, 144)   # 589824 elems = 4608 rows of 128
    cases.append((jax.random.normal(m1, mshape, dtype=jnp.float32),
                  jax.random.normal(m2, mshape, dtype=jnp.float32),
                  (jax.random.uniform(m3, mshape) > 0.5).astype(jnp.float32),
                  (jax.random.uniform(m4, mshape) > 0.3).astype(jnp.float32),
                  0.7))

    results = []
    for (t, p, om, dm, w) in cases:
        out = xsigmoid_loss(t, p, om, dm, w)
        ref = _reference(t, p, om, dm, w)
        results.append((out, ref))

    jax.block_until_ready(results)
    for idx, (out, ref) in enumerate(results):
        assert jnp.allclose(out, ref, atol=2e-4, rtol=2e-4), (idx, out, ref)
    print("KERNEL_OK")
</pallas_src>

<mosaic_0001>
module attributes {stable_mosaic.version = 11 : i64} {
  func.func @kernel(%arg0: i32, %arg1: i32, %arg2: memref<1xf32, #tpu.memory_space<smem>>, %arg3: memref<16x128xf32, #tpu.memory_space<vmem>>, %arg4: memref<16x128xf32, #tpu.memory_space<vmem>>, %arg5: memref<16x128xf32, #tpu.memory_space<vmem>>, %arg6: memref<16x128xf32, #tpu.memory_space<vmem>>, %arg7: memref<1x8x128xf32, #tpu.memory_space<vmem>>, %arg8: memref<1x8x128xf32, #tpu.memory_space<vmem>>) attributes {dimension_semantics = [#tpu.dimension_semantics<parallel>, #tpu.dimension_semantics<arbitrary>], iteration_bounds = array<i64: 1, 1>, scalar_prefetch = 1 : i64, scratch_operands = 0 : i64, tpu.core_type = #tpu.core_type<tc>, window_params = [{transform_indices = @transform_0, window_bounds = array<i64: 16, 128>}, {transform_indices = @transform_1, window_bounds = array<i64: 16, 128>}, {transform_indices = @transform_2, window_bounds = array<i64: 16, 128>}, {transform_indices = @transform_3, window_bounds = array<i64: 16, 128>}, {transform_indices = @transform_4, window_bounds = array<i64: 1, 8, 128>}, {transform_indices = @transform_5, window_bounds = array<i64: 1, 8, 128>}]} {
    %c0_i32 = arith.constant 0 : i32
    %0 = arith.cmpi eq, %arg1, %c0_i32 : i32
    %1 = arith.extui %0 : i1 to i32
    %c0_i32_0 = arith.constant 0 : i32
    %2 = arith.cmpi ne, %1, %c0_i32_0 : i32
    scf.if %2 {
      %cst_25 = arith.constant 0.000000e+00 : f32
      %36 = vector.broadcast %cst_25 : f32 to vector<1x8x128xf32>
      %c0_26 = arith.constant 0 : index
      %c0_27 = arith.constant 0 : index
      %c0_28 = arith.constant 0 : index
      %37 = vector.load %arg7[%c0_26, %c0_27, %c0_28] : memref<1x8x128xf32, #tpu.memory_space<vmem>>, vector<1x8x128xf32>
      tpu.vector_store %arg7[%c0_26, %c0_27, %c0_28], %36 {strides = array<i32>} : memref<1x8x128xf32, #tpu.memory_space<vmem>>, vector<1x8x128xf32>,
      %cst_29 = arith.constant 0.000000e+00 : f32
      %38 = vector.broadcast %cst_29 : f32 to vector<1x8x128xf32>
      %c0_30 = arith.constant 0 : index
      %c0_31 = arith.constant 0 : index
      %c0_32 = arith.constant 0 : index
      %39 = vector.load %arg8[%c0_30, %c0_31, %c0_32] : memref<1x8x128xf32, #tpu.memory_space<vmem>>, vector<1x8x128xf32>
      tpu.vector_store %arg8[%c0_30, %c0_31, %c0_32], %38 {strides = array<i32>} : memref<1x8x128xf32, #tpu.memory_space<vmem>>, vector<1x8x128xf32>,
    } else {
    }
    %c0 = arith.constant 0 : index
    %c0_1 = arith.constant 0 : index
    %3 = vector.load %arg3[%c0, %c0_1] : memref<16x128xf32, #tpu.memory_space<vmem>>, vector<16x128xf32>
    %c0_2 = arith.constant 0 : index
    %c0_3 = arith.constant 0 : index
    %4 = vector.load %arg4[%c0_2, %c0_3] : memref<16x128xf32, #tpu.memory_space<vmem>>, vector<16x128xf32>
    %5 = arith.subf %3, %4 : vector<16x128xf32>
    %cst = arith.constant 5.000000e-01 : f32
    %6 = vector.broadcast %cst : f32 to vector<16x128xf32>
    %7 = arith.mulf %6, %5 : vector<16x128xf32>
    %8 = math.tanh %7 : vector<16x128xf32>
    %9 = arith.mulf %5, %8 : vector<16x128xf32>
    %c0_4 = arith.constant 0 : index
    %c0_5 = arith.constant 0 : index
    %10 = vector.load %arg5[%c0_4, %c0_5] : memref<16x128xf32, #tpu.memory_space<vmem>>, vector<16x128xf32>
    %c0_6 = arith.constant 0 : index
    %11 = memref.load %arg2[%c0_6] : memref<1xf32, #tpu.memory_space<smem>>
    %cst_7 = arith.constant 1.000000e+00 : f32
    %12 = arith.subf %11, %cst_7 : f32
    %13 = vector.broadcast %12 : f32 to vector<16x128xf32>
    %14 = arith.mulf %10, %13 : vector<16x128xf32>
    %cst_8 = arith.constant 1.000000e+00 : f32
    %15 = vector.broadcast %cst_8 : f32 to vector<16x128xf32>
    %16 = arith.addf %14, %15 : vector<16x128xf32>
    %17 = arith.mulf %9, %16 : vector<16x128xf32>
    %c0_9 = arith.constant 0 : index
    %c0_10 = arith.constant 0 : index
    %18 = vector.load %arg6[%c0_9, %c0_10] : memref<16x128xf32, #tpu.memory_space<vmem>>, vector<16x128xf32>
    %19 = arith.mulf %17, %18 : vector<16x128xf32>
    %c0_11 = arith.constant 0 : index
    %c0_12 = arith.constant 0 : index
    %c0_13 = arith.constant 0 : index
    %20 = vector.load %arg8[%c0_11, %c0_12, %c0_13] : memref<1x8x128xf32, #tpu.memory_space<vmem>>, vector<1x8x128xf32>
    %21 = vector.shape_cast %20 : vector<1x8x128xf32> to vector<8x128xf32>
    %22 = vector.shape_cast %18 : vector<16x128xf32> to vector<2x8x128xf32>
    %cst_14 = arith.constant dense<0.000000e+00> : vector<8x128xf32>
    %23 = vector.multi_reduction <add>, %22, %cst_14 [0] : vector<2x8x128xf32> to vector<8x128xf32>
    %24 = arith.addf %21, %23 : vector<8x128xf32>
    %c0_15 = arith.constant 0 : index
    %c0_16 = arith.constant 0 : index
    %c0_17 = arith.constant 0 : index
    %25 = vector.load %arg8[%c0_15, %c0_16, %c0_17] : memref<1x8x128xf32, #tpu.memory_space<vmem>>, vector<1x8x128xf32>
    %26 = vector.shape_cast %25 : vector<1x8x128xf32> to vector<8x128xf32>
    %27 = vector.shape_cast %24 : vector<8x128xf32> to vector<1x8x128xf32>
    tpu.vector_store %arg8[%c0_15, %c0_16, %c0_17], %27 {strides = array<i32>} : memref<1x8x128xf32, #tpu.memory_space<vmem>>, vector<1x8x128xf32>,
    %c0_18 = arith.constant 0 : index
    %c0_19 = arith.constant 0 : index
    %c0_20 = arith.constant 0 : index
    %28 = vector.load %arg7[%c0_18, %c0_19, %c0_20] : memref<1x8x128xf32, #tpu.memory_space<vmem>>, vector<1x8x128xf32>
    %29 = vector.shape_cast %28 : vector<1x8x128xf32> to vector<8x128xf32>
    %30 = vector.shape_cast %19 : vector<16x128xf32> to vector<2x8x128xf32>
    %cst_21 = arith.constant dense<0.000000e+00> : vector<8x128xf32>
    %31 = vector.multi_reduction <add>, %30, %cst_21 [0] : vector<2x8x128xf32> to vector<8x128xf32>
    %32 = arith.addf %29, %31 : vector<8x128xf32>
    %c0_22 = arith.constant 0 : index
    %c0_23 = arith.constant 0 : index
    %c0_24 = arith.constant 0 : index
    %33 = vector.load %arg7[%c0_22, %c0_23, %c0_24] : memref<1x8x128xf32, #tpu.memory_space<vmem>>, vector<1x8x128xf32>
    %34 = vector.shape_cast %33 : vector<1x8x128xf32> to vector<8x128xf32>
    %35 = vector.shape_cast %32 : vector<8x128xf32> to vector<1x8x128xf32>
    tpu.vector_store %arg7[%c0_22, %c0_23, %c0_24], %35 {strides = array<i32>} : memref<1x8x128xf32, #tpu.memory_space<vmem>>, vector<1x8x128xf32>,
    return
  }
  func.func @transform_0(%arg0: i32, %arg1: i32, %arg2: memref<1xf32, #tpu.memory_space<smem>>) -> (i32, i32) {
    %c1_i32 = arith.constant 1 : i32
    %0 = arith.muli %arg0, %c1_i32 : i32
    %1 = arith.addi %0, %arg1 : i32
    %c0_i32 = arith.constant 0 : i32
    %2 = arith.minsi %1, %c0_i32 : i32
    %c0_i32_0 = arith.constant 0 : i32
    %c0_i32_1 = arith.constant 0 : i32
    return %2, %c0_i32_0 : i32, i32
  }
  func.func @transform_1(%arg0: i32, %arg1: i32, %arg2: memref<1xf32, #tpu.memory_space<smem>>) -> (i32, i32) {
    %c1_i32 = arith.constant 1 : i32
    %0 = arith.muli %arg0, %c1_i32 : i32
    %1 = arith.addi %0, %arg1 : i32
    %c0_i32 = arith.constant 0 : i32
    %2 = arith.minsi %1, %c0_i32 : i32
    %c0_i32_0 = arith.constant 0 : i32
    %c0_i32_1 = arith.constant 0 : i32
    return %2, %c0_i32_0 : i32, i32
  }
  func.func @transform_2(%arg0: i32, %arg1: i32, %arg2: memref<1xf32, #tpu.memory_space<smem>>) -> (i32, i32) {
    %c1_i32 = arith.constant 1 : i32
    %0 = arith.muli %arg0, %c1_i32 : i32
    %1 = arith.addi %0, %arg1 : i32
    %c0_i32 = arith.constant 0 : i32
    %2 = arith.minsi %1, %c0_i32 : i32
    %c0_i32_0 = arith.constant 0 : i32
    %c0_i32_1 = arith.constant 0 : i32
    return %2, %c0_i32_0 : i32, i32
  }
  func.func @transform_3(%arg0: i32, %arg1: i32, %arg2: memref<1xf32, #tpu.memory_space<smem>>) -> (i32, i32) {
    %c1_i32 = arith.constant 1 : i32
    %0 = arith.muli %arg0, %c1_i32 : i32
    %1 = arith.addi %0, %arg1 : i32
    %c0_i32 = arith.constant 0 : i32
    %2 = arith.minsi %1, %c0_i32 : i32
    %c0_i32_0 = arith.constant 0 : i32
    %c0_i32_1 = arith.constant 0 : i32
    return %2, %c0_i32_0 : i32, i32
  }
  func.func @transform_4(%arg0: i32, %arg1: i32, %arg2: memref<1xf32, #tpu.memory_space<smem>>) -> (i32, i32, i32) {
    %c0_i32 = arith.constant 0 : i32
    %c0_i32_0 = arith.constant 0 : i32
    %c0_i32_1 = arith.constant 0 : i32
    return %arg0, %c0_i32, %c0_i32_0 : i32, i32, i32
  }
  func.func @transform_5(%arg0: i32, %arg1: i32, %arg2: memref<1xf32, #tpu.memory_space<smem>>) -> (i32, i32, i32) {
    %c0_i32 = arith.constant 0 : i32
    %c0_i32_0 = arith.constant 0 : i32
    %c0_i32_1 = arith.constant 0 : i32
    return %arg0, %c0_i32, %c0_i32_0 : i32, i32, i32
  }
}

</mosaic_0001>

<bundles_post_ra>
// kernel: tpu_custom_call.1
= control target key start
LH: loop header
LB: loop body
LE: loop exit
PB: predicated region body
PF: predicated region fallthrough
CT: control target
= control target key end

     0   :  { %13 = vsyncpa [#allocation5], 0  ;;  %s442_s0 = inlined_call_operand.<no memory space> [shape: f32[1], index: 0, kind: input, shape index: {}]   ;;  %s443_s1 = inlined_call_operand.hbm [shape: f32[16,128], index: 1, kind: input, shape index: {}]   ;;  %s444_s2 = inlined_call_operand.hbm [shape: f32[16,128], index: 2, kind: input, shape index: {}]   ;;  %s445_s3 = inlined_call_operand.hbm [shape: f32[16,128], index: 3, kind: input, shape index: {}]   ;;  %s446_s4 = inlined_call_operand.hbm [shape: f32[16,128], index: 4, kind: input, shape index: {}]   ;;  %s447_s5 = inlined_call_operand.hbm [shape: f32[1,8,128], index: 5, kind: output, shape index: {0}]   ;;  %s448_s6 = inlined_call_operand.hbm [shape: f32[1,8,128], index: 6, kind: output, shape index: {1}]  }
   0x1   :  { %14 = vsyncpa [#allocation8], 0 }
   0x2   :  { %15 = vsyncpa [#allocation11], 0 }
   0x3   :  { %16 = vsyncpa [#allocation6], 0 }
   0x4   :  { %17 = vsyncpa [#allocation14], 0  ;;  %s47_s23 = sshll.u32 %s444_s2, 4  ;;  %s378_s24 = smov [#allocation7]   ;;  %s48_s23 = int_to_ptr.hbm [resolvable:$true] %s47_s23 }
   0x5   :  { %s49_s25 = sshll.u32 %s378_s24, 4  ;;  %s28_s28 = sshll.u32 %s443_s1, 4  ;;  %s50_s25 = int_to_ptr.vmem [resolvable:$true] %s49_s25  ;;  %s29_s28 = int_to_ptr.hbm [resolvable:$true] %s28_s28 }
   0x6   :  { %s379_s29 = smov 128   ;;  %s380_s30 = smov 8  }
   0x7   :  { %55 = dma.hbm_to_vmem [thread:$0]  %s48_s23, 256, %s50_s25, [#allocation8], %s379_s29, %s379_s29, %s380_s30  }
   0x8   :  { %s381_s7 = smov [#allocation4]   ;;  %s66_s11 = sshll.u32 %s445_s3, 4  ;;  %s67_s11 = int_to_ptr.hbm [resolvable:$true] %s66_s11 }
   0x9   :  { %s30_s8 = sshll.u32 %s381_s7, 4  ;;  %s85_s13 = sshll.u32 %s446_s4, 4  ;;  %s31_s8 = int_to_ptr.vmem [resolvable:$true] %s30_s8  ;;  %s86_s13 = int_to_ptr.hbm [resolvable:$true] %s85_s13 }
   0xa   :  { %36 = dma.hbm_to_vmem [thread:$0]  %s29_s28, 256, %s31_s8, [#allocation5], %s379_s29, %s379_s29, %s380_s30  }
   0xb   :  { %s382_s14 = smov [#allocation9]   ;;  %s383_s1 = smov [#allocation10]  }
   0xc   :  { %s68_s15 = sshll.u32 %s382_s14, 4  ;;  %s87_s16 = sshll.u32 %s383_s1, 4  ;;  %s69_s15 = int_to_ptr.vmem [resolvable:$true] %s68_s15  ;;  %s88_s16 = int_to_ptr.vmem [resolvable:$true] %s87_s16 }
   0xd   :  { %74 = dma.hbm_to_vmem [thread:$0]  %s67_s11, 256, %s69_s15, [#allocation8], %s379_s29, %s379_s29, %s380_s30  }
   0xe   :  { %93 = dma.hbm_to_vmem [thread:$0]  %s86_s13, 256, %s88_s16, [#allocation11], %s379_s29, %s379_s29, %s380_s30  }
   0xf   :  { %368 = dma.done.wait [#allocation5], 256  }
  0x10   :  { %369 = vsyncadd [#allocation5], 4294967040 }
  0x11   :  { %370 = dma.done.wait [#allocation8], 512  }
  0x12   :  { %371 = vsyncadd [#allocation8], 4294966784 }
  0x13   :  { %372 = dma.done.wait [#allocation11], 256  }
  0x14   :  { %373 = vsyncadd [#allocation11], 4294967040  ;;  %s210_s18 = sadd.f32 -1.0, %s442_s0  ;;  %v155_v0 = vld [vmem:[#allocation10] sm:$0xff]  ;;  %v156_v1 = vld [vmem:[#allocation10 + $0x8] sm:$0xff]  ;;  %s384_s4 = smov [#allocation13]  }
  0x15   :  { %v132_v2 = vld [vmem:[#allocation4] sm:$0xff]  ;;  %s183_s19 = sshll.u32 %s384_s4, 4  ;;  %s185_s22 = sshll.u32 %s448_s6, 4  ;;  %v160_v3 = vadd.f32 %v156_v1, %v155_v0  ;;  %v133_v4 = vld [vmem:[#allocation4 + $0x8] sm:$0xff]  ;;  %v134_v5 = vld [vmem:[#allocation7] sm:$0xff]  ;;  %s184_s19 = int_to_ptr.vmem [resolvable:$true] %s183_s19  ;;  %s186_s22 = int_to_ptr.hbm [resolvable:$true] %s185_s22 }
  0x16   :  { %v135_v6 = vld [vmem:[#allocation7 + $0x8] sm:$0xff]  ;;  %v136_v7 = vsub.f32 %v132_v2, %v134_v5  ;;  %v144_v11 = vld [vmem:[#allocation9] sm:$0xff]  ;;  %v148_v12 = vstv %s210_s18  ;;  %v145_v13 = vld [vmem:[#allocation9 + $0x8] sm:$0xff]  ;;  %s385_s0 = smov [#allocation12]   ;;  %s174_s25 = sshll.u32 %s447_s5, 4  ;;  %s175_s25 = int_to_ptr.hbm [resolvable:$true] %s174_s25 }
  0x17   :  { %v137_v8 = vsub.f32 %v133_v4, %v135_v6  ;;  %162 = vst [vmem:[#allocation13] sm:$0xff] %v160_v3  ;;  %v149_v14 = vmul.f32 %v148_v12, %v144_v11  ;;  %v150_v15 = vmul.f32 %v148_v12, %v145_v13  ;;  %s172_s6 = sshll.u32 %s385_s0, 4  ;;  %s173_s6 = int_to_ptr.vmem [resolvable:$true] %s172_s6 }
  0x18   :  { %v138_v9 = vmul.f32 0.5, %v136_v7  ;;  %188 = dma.vmem_to_hbm [thread:$0]  %s184_s19, 128, %s186_s22, [#allocation14]  }
  0x19   :  { %v139_v10 = vmul.f32 0.5, %v137_v8  ;;  %v151_v16 = vadd.f32 1.0, %v149_v14  ;;  %v152_v18 = vadd.f32 1.0, %v150_v15 }
  0x1a   :  { %220 = vtanh.f32 %v138_v9 }
  0x1b   :  { %222 = vtanh.f32 %v139_v10 }
  0x20   :  { %v221_v17 = vpop.eup %220 }
  0x21   :  { %v223_v19 = vpop.eup %222  ;;  %v142_v20 = vmul.f32 %v221_v17, %v136_v7 }
  0x22   :  { %v143_v21 = vmul.f32 %v223_v19, %v137_v8 }
  0x23   :  { %v153_v22 = vmul.f32 %v151_v16, %v142_v20 }
  0x24   :  { %v154_v23 = vmul.f32 %v152_v18, %v143_v21 }
  0x25   :  { %v157_v24 = vmul.f32 %v155_v0, %v153_v22 }
  0x26   :  { %v158_v25 = vmul.f32 %v156_v1, %v154_v23 }
  0x28   :  { %v164_v26 = vadd.f32 %v158_v25, %v157_v24 }
  0x2a   :  { %166 = vst [vmem:[#allocation12] sm:$0xff] %v164_v26 }
  0x2b   :  { %177 = dma.vmem_to_hbm [thread:$0]  %s173_s6, 128, %s175_s25, [#allocation6]  }
  0x2c   :  { %374 = dma.done.wait [#allocation6], 128  }
  0x2d   :  { %375 = vsyncadd [#allocation6], 4294967168 }
  0x2e   :  { %376 = dma.done.wait [#allocation14], 128  }
  0x2f   :  { %377 = vsyncadd [#allocation14], 4294967168 }
  0x30   :  { %197 = vsyncpa [#allocation5], 1 }
  0x31   :  { %198 = vsyncpa [#allocation8], 1 }
  0x32   :  { %199 = vsyncpa [#allocation11], 1 }
  0x33   :  { %200 = vsyncpa [#allocation6], 1 }
  0x34   :  { %201 = vsyncpa [#allocation14], 1 }

</bundles_post_ra>
